<compile_context>
chip_gen: v6e
topology: v6e:2x2x1
jax: 0.10.0
libtpu: 0.0.40
codegen_flags: <defaults>
</compile_context>

<pallas_src>
import jax
import jax.numpy as jnp
from jax.experimental import pallas as pl
from jax.experimental.pallas import tpu as pltpu


def _round_up(n, m):
    return ((n + m - 1) // m) * m


def _vmem_capacity_bytes():
    try:
        return int(pltpu.get_tpu_info().vmem_capacity_bytes)
    except Exception:
        return 64 << 20  # conservative fallback (v7x-sized VMEM)


def _feed_forward_kernel(x_ref, w1_ref, b1_ref, w2_ref, b2_ref, o_ref, acc_ref):
    # x_ref : (tile_rows, d_model_p)   caller dtype
    # w1_ref: (d_model_p, tile_ff)     caller dtype (block of W1.T)
    # b1_ref: (1, tile_ff)             f32
    # w2_ref: (tile_ff, d_model_p)     caller dtype (block of W2.T)
    # b2_ref: (1, d_model_p)           f32
    # o_ref : (tile_rows, d_model_p)   caller dtype
    # acc_ref: (tile_rows, d_model_p)  f32 scratch, accumulates over ff tiles
    k = pl.program_id(1)

    @pl.when(k == 0)
    def _():
        acc_ref[...] = jnp.zeros_like(acc_ref)

    # MXU operands stay in the caller dtype (bf16 runs at full MXU rate);
    # accumulation is f32 via preferred_element_type only.
    h = jnp.dot(x_ref[...], w1_ref[...], preferred_element_type=jnp.float32)
    # Bias + ReLU in f32, then cast back to the I/O dtype so the second matmul
    # also runs at native MXU rate and the (tile_rows, tile_ff) temp stays small.
    h = jnp.maximum(h + b1_ref[...], 0.0).astype(x_ref.dtype)

    # TODO(synk): nn.Dropout is identity in eval/inference mode (implemented
    # here); training-mode dropout would need pltpu.prng_seed + stateful_bernoulli.

    acc_ref[...] += jnp.dot(h, w2_ref[...], preferred_element_type=jnp.float32)

    @pl.when(k == pl.num_programs(1) - 1)
    def _():
        o_ref[...] = (acc_ref[...] + b2_ref[...]).astype(o_ref.dtype)


def prepare_ffn_params(w1, b1, w2, b2):
    """One-time parameter prep (call once at parameter-load time, not per step).

    Accepts nn.Linear layout:
      w1: (d_ff, d_model), b1: (d_ff,)   -- linear_1
      w2: (d_model, d_ff), b2: (d_model,)-- linear_2
    Returns MXU-friendly, 128-lane-padded tensors:
      w1t: (d_model_p, d_ff_p), b1p: (1, d_ff_p)  f32
      w2t: (d_ff_p, d_model_p), b2p: (1, d_model_p) f32
    """
    d_ff, d_model = w1.shape
    d_model_p = _round_up(d_model, 128)
    d_ff_p = _round_up(d_ff, 128)

    w1t = jnp.zeros((d_model_p, d_ff_p), w1.dtype).at[:d_model, :d_ff].set(w1.T)
    w2t = jnp.zeros((d_ff_p, d_model_p), w2.dtype).at[:d_ff, :d_model].set(w2.T)
    b1p = jnp.zeros((1, d_ff_p), jnp.float32).at[0, :d_ff].set(b1.astype(jnp.float32))
    b2p = jnp.zeros((1, d_model_p), jnp.float32).at[0, :d_model].set(b2.astype(jnp.float32))
    return w1t, b1p, w2t, b2p


def _estimate_vmem(tile_rows, tile_ff, d_model_p, d_ff_p, io_item, w_item):
    n_wbuf = 2 if tile_ff < d_ff_p else 1  # streamed weight blocks double-buffer
    est = 0
    est += 2 * tile_rows * d_model_p * io_item        # x tile (double-buffered)
    est += 2 * tile_rows * d_model_p * io_item        # out tile (double-buffered)
    est += n_wbuf * d_model_p * tile_ff * w_item      # W1.T block
    est += n_wbuf * tile_ff * d_model_p * w_item      # W2.T block
    est += n_wbuf * tile_ff * 4 + d_model_p * 4       # biases (f32)
    est += tile_rows * d_model_p * 4                  # f32 accumulator scratch
    est += tile_rows * tile_ff * (4 + io_item)        # f32 h + low-precision copy
    return est


def feed_forward_pallas(x, w1t, b1, w2t, b2, *, tile_rows=512):
    """FeedForward forward pass (eval / inference semantics).

    x   : (..., d_model)
    w1t, b1, w2t, b2: as returned by `prepare_ffn_params`.
    """
    orig_shape = x.shape
    d_model = orig_shape[-1]
    d_model_p, d_ff_p = w1t.shape

    x2 = x.reshape(-1, d_model)
    rows = x2.shape[0]

    io_item = jnp.dtype(x.dtype).itemsize
    w_item = jnp.dtype(w1t.dtype).itemsize
    row_align = 16 if io_item < 4 else 8

    # Generation-aware VMEM budget: ~3/4 of physical VMEM
    # (96 MiB on v5e/v6e's 128 MiB, 48 MiB on v7x's 64 MiB).
    budget = (_vmem_capacity_bytes() * 3) // 4

    def fits(tr, tf):
        est = _estimate_vmem(tr, tf, d_model_p, d_ff_p, io_item, w_item)
        return est * 5 // 4 <= budget  # 25% headroom

    # Row tile: multiple of the sublane packing, clamped to the problem size.
    tile_rows = max(row_align, (int(tile_rows) // row_align) * row_align)
    tile_rows = min(tile_rows, _round_up(rows, row_align))

    # ff tile: prefer whole-weight residency; otherwise stream over d_ff with a
    # 128-lane-aligned tile that evenly divides the padded d_ff.
    m = d_ff_p // 128
    tile_ff = 128
    for d in range(m, 0, -1):
        if m % d == 0 and fits(tile_rows, 128 * d):
            tile_ff = 128 * d
            break
    # Last resort: shrink the row tile until everything fits the VMEM budget.
    while not fits(tile_rows, tile_ff) and tile_rows > row_align:
        tile_rows = max(row_align, ((tile_rows // 2) // row_align) * row_align)

    num_row_tiles = pl.cdiv(rows, tile_rows)
    # v7x has 2 TensorCores: keep the "parallel" row axis from collapsing to a
    # single grid step for small/medium inputs.
    if num_row_tiles == 1 and rows >= 2 * row_align:
        tile_rows = _round_up(pl.cdiv(rows, 2), row_align)
        num_row_tiles = pl.cdiv(rows, tile_rows)

    padded_rows = num_row_tiles * tile_rows
    num_ff_tiles = d_ff_p // tile_ff

    # Ragged rows / narrow d_model: zero-pad once (zeros contribute nothing).
    pad_r = padded_rows - rows
    pad_c = d_model_p - d_model
    if pad_r or pad_c:
        x2 = jnp.pad(x2, ((0, pad_r), (0, pad_c)))

    # Constant-index operands do not need double buffering.
    w_pipe = pl.Buffered(1) if num_ff_tiles == 1 else None
    const_pipe = pl.Buffered(1)

    est = _estimate_vmem(tile_rows, tile_ff, d_model_p, d_ff_p, io_item, w_item)
    vmem_limit_bytes = int(min(max(2 * est, 32 << 20), budget))

    flops = 4 * padded_rows * d_model_p * d_ff_p  # two matmuls, 2*M*N*K each
    bytes_accessed = int(
        2 * padded_rows * d_model_p * io_item     # x in + out
        + (w1t.size + w2t.size) * w_item
        + (b1.size + b2.size) * 4)

    out = pl.pallas_call(
        _feed_forward_kernel,
        out_shape=jax.ShapeDtypeStruct((padded_rows, d_model_p), x.dtype),
        grid_spec=pltpu.PrefetchScalarGridSpec(
            num_scalar_prefetch=0,
            grid=(num_row_tiles, num_ff_tiles),
            in_specs=[
                pl.BlockSpec((tile_rows, d_model_p), lambda i, k: (i, 0)),
                pl.BlockSpec((d_model_p, tile_ff), lambda i, k: (0, k),
                             pipeline_mode=w_pipe),
                pl.BlockSpec((1, tile_ff), lambda i, k: (0, k),
                             pipeline_mode=w_pipe),
                pl.BlockSpec((tile_ff, d_model_p), lambda i, k: (k, 0),
                             pipeline_mode=w_pipe),
                pl.BlockSpec((1, d_model_p), lambda i, k: (0, 0),
                             pipeline_mode=const_pipe),
            ],
            out_specs=pl.BlockSpec((tile_rows, d_model_p), lambda i, k: (i, 0)),
            scratch_shapes=[pltpu.VMEM((tile_rows, d_model_p), jnp.float32)],
        ),
        compiler_params=pltpu.CompilerParams(
            dimension_semantics=("parallel", "arbitrary"),
            vmem_limit_bytes=vmem_limit_bytes,
        ),
        cost_estimate=pl.CostEstimate(
            flops=flops, transcendentals=0, bytes_accessed=bytes_accessed),
    )(x2, w1t, b1, w2t, b2)

    if pad_r or pad_c:
        out = out[:rows, :d_model]
    return out.reshape(orig_shape)


if __name__ == "__main__":
    # Small shapes consistent with the module: batch=2, seq=8, d_model=32,
    # d_ff=80 (the module's default).
    batch, seq, d_model, d_ff = 2, 8, 32, 80

    key = jax.random.PRNGKey(0)
    kx, kw1, kb1, kw2, kb2 = jax.random.split(key, 5)

    x = jax.random.normal(kx, (batch, seq, d_model), dtype=jnp.float32)

    # nn.Linear-style parameters (out_features, in_features), small uniform init.
    lim1 = 1.0 / (d_model ** 0.5)
    lim2 = 1.0 / (d_ff ** 0.5)
    w1 = jax.random.uniform(kw1, (d_ff, d_model), jnp.float32, -lim1, lim1)
    b1 = jax.random.uniform(kb1, (d_ff,), jnp.float32, -lim1, lim1)
    w2 = jax.random.uniform(kw2, (d_model, d_ff), jnp.float32, -lim2, lim2)
    b2 = jax.random.uniform(kb2, (d_model,), jnp.float32, -lim2, lim2)

    # One-time parameter prep (transpose + 128-lane zero padding), outside the
    # hot path — this is the "pre-transpose at parameter load" fix.
    params = prepare_ffn_params(w1, b1, w2, b2)

    ff = jax.jit(feed_forward_pallas)
    out = ff(x, *params)
    jax.block_until_ready(out)

    # Plain-JAX reference (eval mode: dropout is identity).
    h_ref = jnp.maximum(jnp.einsum("bsd,fd->bsf", x, w1) + b1, 0.0)
    ref = jnp.einsum("bsf,df->bsd", h_ref, w2) + b2
    assert out.shape == ref.shape, "shape mismatch vs reference"
    assert jnp.allclose(out, ref, atol=1e-4, rtol=1e-4), "mismatch vs reference"

    print("KERNEL_OK")
</pallas_src>

<mosaic_0001>
module attributes {stable_mosaic.version = 11 : i64} {
  func.func @_feed_forward_kernel(%arg0: i32, %arg1: i32, %arg2: memref<8x128xf32, #tpu.memory_space<vmem>>, %arg3: memref<128x128xf32, #tpu.memory_space<vmem>>, %arg4: memref<1x128xf32, #tpu.memory_space<vmem>>, %arg5: memref<128x128xf32, #tpu.memory_space<vmem>>, %arg6: memref<1x128xf32, #tpu.memory_space<vmem>>, %arg7: memref<8x128xf32, #tpu.memory_space<vmem>>, %arg8: memref<8x128xf32, #tpu.memory_space<vmem>>) attributes {dimension_semantics = [#tpu.dimension_semantics<parallel>, #tpu.dimension_semantics<arbitrary>], iteration_bounds = array<i64: 2, 1>, scalar_prefetch = 0 : i64, scratch_operands = 1 : i64, tpu.core_type = #tpu.core_type<tc>, window_params = [{transform_indices = @transform_0, window_bounds = array<i64: 8, 128>}, {pipeline_mode = #tpu.pipeline_mode<synchronous>, transform_indices = @transform_1, window_bounds = array<i64: 128, 128>}, {pipeline_mode = #tpu.pipeline_mode<synchronous>, transform_indices = @transform_2, window_bounds = array<i64: 1, 128>}, {pipeline_mode = #tpu.pipeline_mode<synchronous>, transform_indices = @transform_3, window_bounds = array<i64: 128, 128>}, {pipeline_mode = #tpu.pipeline_mode<synchronous>, transform_indices = @transform_4, window_bounds = array<i64: 1, 128>}, {transform_indices = @transform_5, window_bounds = array<i64: 8, 128>}]} {
    %c0_i32 = arith.constant 0 : i32
    %0 = arith.cmpi eq, %arg1, %c0_i32 : i32
    %1 = arith.extui %0 : i1 to i32
    %c0_i32_0 = arith.constant 0 : i32
    %2 = arith.cmpi ne, %1, %c0_i32_0 : i32
    scf.if %2 {
      %cst_16 = arith.constant 0.000000e+00 : f32
      %19 = vector.broadcast %cst_16 : f32 to vector<8x128xf32>
      %c0_17 = arith.constant 0 : index
      %c0_18 = arith.constant 0 : index
      %20 = vector.load %arg8[%c0_17, %c0_18] : memref<8x128xf32, #tpu.memory_space<vmem>>, vector<8x128xf32>
      tpu.vector_store %arg8[%c0_17, %c0_18], %19 {strides = array<i32>} : memref<8x128xf32, #tpu.memory_space<vmem>>, vector<8x128xf32>,
    } else {
    }
    %c0 = arith.constant 0 : index
    %c0_1 = arith.constant 0 : index
    %3 = vector.load %arg2[%c0, %c0_1] : memref<8x128xf32, #tpu.memory_space<vmem>>, vector<8x128xf32>
    %c0_2 = arith.constant 0 : index
    %c0_3 = arith.constant 0 : index
    %4 = vector.load %arg3[%c0_2, %c0_3] : memref<128x128xf32, #tpu.memory_space<vmem>>, vector<128x128xf32>
    %cst = arith.constant dense<0.000000e+00> : vector<8x128xf32>
    %5 = tpu.matmul %3, %4, %cst {dimension_numbers = #tpu.dot_dimension_numbers<[1], [0], [0], [1], [0, 0, 1, 1], [], []>} : vector<8x128xf32>, vector<128x128xf32>, vector<8x128xf32> -> vector<8x128xf32>
    %c0_4 = arith.constant 0 : index
    %c0_5 = arith.constant 0 : index
    %6 = vector.load %arg4[%c0_4, %c0_5] : memref<1x128xf32, #tpu.memory_space<vmem>>, vector<1x128xf32>
    %7 = vector.broadcast %6 : vector<1x128xf32> to vector<8x128xf32>
    %8 = arith.addf %5, %7 : vector<8x128xf32>
    %cst_6 = arith.constant 0.000000e+00 : f32
    %9 = vector.broadcast %cst_6 : f32 to vector<8x128xf32>
    %10 = arith.maximumf %8, %9 : vector<8x128xf32>
    %c0_7 = arith.constant 0 : index
    %c0_8 = arith.constant 0 : index
    %11 = vector.load %arg8[%c0_7, %c0_8] : memref<8x128xf32, #tpu.memory_space<vmem>>, vector<8x128xf32>
    %c0_9 = arith.constant 0 : index
    %c0_10 = arith.constant 0 : index
    %12 = vector.load %arg5[%c0_9, %c0_10] : memref<128x128xf32, #tpu.memory_space<vmem>>, vector<128x128xf32>
    %cst_11 = arith.constant dense<0.000000e+00> : vector<8x128xf32>
    %13 = tpu.matmul %10, %12, %cst_11 {dimension_numbers = #tpu.dot_dimension_numbers<[1], [0], [0], [1], [0, 0, 1, 1], [], []>} : vector<8x128xf32>, vector<128x128xf32>, vector<8x128xf32> -> vector<8x128xf32>
    %14 = arith.addf %11, %13 : vector<8x128xf32>
    %c0_12 = arith.constant 0 : index
    %c0_13 = arith.constant 0 : index
    %15 = vector.load %arg8[%c0_12, %c0_13] : memref<8x128xf32, #tpu.memory_space<vmem>>, vector<8x128xf32>
    tpu.vector_store %arg8[%c0_12, %c0_13], %14 {strides = array<i32>} : memref<8x128xf32, #tpu.memory_space<vmem>>, vector<8x128xf32>,
    %c0_i32_14 = arith.constant 0 : i32
    %16 = arith.cmpi eq, %arg1, %c0_i32_14 : i32
    %17 = arith.extui %16 : i1 to i32
    %c0_i32_15 = arith.constant 0 : i32
    %18 = arith.cmpi ne, %17, %c0_i32_15 : i32
    scf.if %18 {
      %c0_16 = arith.constant 0 : index
      %c0_17 = arith.constant 0 : index
      %19 = vector.load %arg8[%c0_16, %c0_17] : memref<8x128xf32, #tpu.memory_space<vmem>>, vector<8x128xf32>
      %c0_18 = arith.constant 0 : index
      %c0_19 = arith.constant 0 : index
      %20 = vector.load %arg6[%c0_18, %c0_19] : memref<1x128xf32, #tpu.memory_space<vmem>>, vector<1x128xf32>
      %21 = vector.broadcast %20 : vector<1x128xf32> to vector<8x128xf32>
      %22 = arith.addf %19, %21 : vector<8x128xf32>
      %c0_20 = arith.constant 0 : index
      %c0_21 = arith.constant 0 : index
      %23 = vector.load %arg7[%c0_20, %c0_21] : memref<8x128xf32, #tpu.memory_space<vmem>>, vector<8x128xf32>
      tpu.vector_store %arg7[%c0_20, %c0_21], %22 {strides = array<i32>} : memref<8x128xf32, #tpu.memory_space<vmem>>, vector<8x128xf32>,
    } else {
    }
    return
  }
  func.func @transform_0(%arg0: i32, %arg1: i32) -> (i32, i32) {
    %c0_i32 = arith.constant 0 : i32
    %c0_i32_0 = arith.constant 0 : i32
    return %arg0, %c0_i32 : i32, i32
  }
  func.func @transform_1(%arg0: i32, %arg1: i32) -> (i32, i32) {
    %c0_i32 = arith.constant 0 : i32
    %c0_i32_0 = arith.constant 0 : i32
    return %c0_i32, %arg1 : i32, i32
  }
  func.func @transform_2(%arg0: i32, %arg1: i32) -> (i32, i32) {
    %c0_i32 = arith.constant 0 : i32
    %c0_i32_0 = arith.constant 0 : i32
    return %c0_i32, %arg1 : i32, i32
  }
  func.func @transform_3(%arg0: i32, %arg1: i32) -> (i32, i32) {
    %c0_i32 = arith.constant 0 : i32
    %c0_i32_0 = arith.constant 0 : i32
    return %arg1, %c0_i32 : i32, i32
  }
  func.func @transform_4(%arg0: i32, %arg1: i32) -> (i32, i32) {
    %c0_i32 = arith.constant 0 : i32
    %c0_i32_0 = arith.constant 0 : i32
    %c0_i32_1 = arith.constant 0 : i32
    return %c0_i32, %c0_i32_0 : i32, i32
  }
  func.func @transform_5(%arg0: i32, %arg1: i32) -> (i32, i32) {
    %c0_i32 = arith.constant 0 : i32
    %c0_i32_0 = arith.constant 0 : i32
    return %arg0, %c0_i32 : i32, i32
  }
}

</mosaic_0001>

<bundles_post_ra>
// kernel: feed_forward_pallas.1
= control target key start
LH: loop header
LB: loop body
LE: loop exit
PB: predicated region body
PF: predicated region fallthrough
CT: control target
= control target key end

     0   :  { %10 = vsyncpa [#allocation4], 0  ;;  %s1012_s0 = inlined_call_operand.vmem [shape: f32[16,128], index: 0, kind: input, shape index: {}]   ;;  %s1013_s1 = inlined_call_operand.hbm [shape: f32[128,128], index: 1, kind: input, shape index: {}]   ;;  %s1014_s2 = inlined_call_operand.vmem [shape: f32[1,128], index: 2, kind: input, shape index: {}]   ;;  %s1015_s3 = inlined_call_operand.hbm [shape: f32[128,128], index: 3, kind: input, shape index: {}]   ;;  %s1016_s4 = inlined_call_operand.vmem [shape: f32[1,128], index: 4, kind: input, shape index: {}]   ;;  %s1017_s5 = inlined_call_operand.vmem [shape: f32[16,128], index: 5, kind: output, shape index: {}]  }
   0x1   :  { %11 = vsyncpa [#allocation6], 0  ;;  %s883_s18 = smov 0   ;;  %s885_s19 = smov 0  }
   0x2   :  { %s887_s20 = smov 0  }
   0x3 LB: > { %s594_s21 = sadd.s32 4294967295, %s845_s20   ;;  %s29_s22 = sadd.s32 1, %s841_s19  ;;  %s845_s20 = sphi %s887_s20, %s17_s20   ;;  %s841_s19 = sphi %s885_s19, %s1022_s19   ;;  %s837_s18 = sphi %s883_s18, %s1021_s18  }
   0x4   : > { %p31_p0 = scmp.ge.s32.totalorder %s29_s22, 2  ;;  %p596_p1 = scmp.ge.s32.totalorder %s845_s20, 1 }
   0x5   : > { %p185_p2 = scmp.lt.s32.totalorder %s845_s20, 3  ;;  %p908_p4 = scmp.eq.s32.totalorder %s594_s21, 0 }
   0x6   : > { %s1024_s22 = smov (%p31_p0, %s29_s22), 0  ;;  %s847_s25 = smov [#allocation3]  }
   0x7   : > { %p904_p3 = pnand %p596_p1, %p185_p2  ;;  %s199_s26 = sshll.u32 %s847_s25, 4  ;;  %s200_s26 = int_to_ptr.vmem [resolvable:$true] %s199_s26 }
   0x8   : > { %s848_s28 = smov [#allocation5]   ;;  %s774_s30 = scalar_lea.vmem %s200_s26, 2048 }
   0x9   : > { %p722_p5 = pneg %p904_p3  ;;  %s221_s29 = sshll.u32 %s848_s28, 4  ;;  %s222_s29 = int_to_ptr.vmem [resolvable:$true] %s221_s29 }
   0xa   : > { %p775_p8 = scmp.ne.s32.totalorder %s200_s26, %s774_s30  ;;  %p782_p11 = scmp.lt.s32.totalorder %s200_s26, %s200_s26 }
   0xb   : > { %p916_p6 = pnand %p908_p4, %p722_p5  ;;  %p783_p12 = scmp.lt.s32.totalorder %s774_s30, %s774_s30 }
   0xd   : > { %p765_p7 = pneg %p916_p6  ;;  %p784_p13 = por %p783_p12, %p782_p11 }
   0xf   : > { %p777_p9 = pnand %p775_p8, %p765_p7 }
  0x11   : > { %p778_p10 = pneg %p777_p9 }
  0x13   : > { %p785_p0 = pnand %p784_p13, %p778_p10 }
  0x15   : > { %788 = shalt.err (!%p785_p0)
}
  0x16   : > { %s849_s6 = smov 128   ;;  %s850_s7 = smov 8  }
  0x17   : > { %725 = dma.hbm_to_vmem [thread:$0]  (!%p916_p6), %s1013_s1, 2048, %s200_s26, [#allocation4], %s849_s6, %s849_s6, %s850_s7  }
  0x18   : > { %s800_s10 = scalar_lea.vmem %s222_s29, 2048  ;;  %p808_p8 = scmp.lt.s32.totalorder %s222_s29, %s222_s29 }
  0x19   : > { %p801_p1 = scmp.ne.s32.totalorder %s222_s29, %s800_s10  ;;  %p809_p9 = scmp.lt.s32.totalorder %s800_s10, %s800_s10 }
  0x1b   : > { %p803_p2 = pnand %p801_p1, %p765_p7  ;;  %p810_p11 = por %p809_p9, %p808_p8 }
  0x1d   : > { %p804_p5 = pneg %p803_p2 }
  0x1f   : > { %p811_p10 = pnand %p810_p11, %p804_p5 }
  0x21   : > { %814 = shalt.err (!%p811_p10)
}
  0x22   : > { %728 = dma.hbm_to_vmem [thread:$0]  (!%p916_p6), %s1015_s3, 2048, %s222_s29, [#allocation6], %s849_s6, %s849_s6, %s850_s7  }
  0x23   : > { %247 = sbr.rel (%p904_p3) target bundleno = 470 (0x1d6), region = 40 }
  0x28   : > { %828 = dma.done.wait (%p908_p4), [#allocation4], 2048  }
  0x29   : > { %830 = vsyncadd (%p908_p4), [#allocation4], 4294965248 }
  0x2a   : > { %832 = dma.done.wait (%p908_p4), [#allocation6], 2048  }
  0x2b   : > { %834 = vsyncadd (%p908_p4), [#allocation6], 4294965248  ;;  %v851_v0 = vmov 0.0   ;;  %vm852_vm0 = vmmov 0   ;;  %v313_v1 = vld [vmem:[#allocation3 + $0x78] sm:$0xff]  ;;  %v312_v2 = vld [vmem:[#allocation3 + $0x70] sm:$0xff] }
  0x2c   : > { %644 = vmatprep.subr.mxu0 %v851_v0  ;;  %676 = vmatprep.mubr.msk.f32.mxu0 %vm852_vm0, %v851_v0  ;;  %v311_v3 = vld [vmem:[#allocation3 + $0x68] sm:$0xff]  ;;  %v310_v4 = vld [vmem:[#allocation3 + $0x60] sm:$0xff]  ;;  %v408_v5 = vld [vmem:[#allocation5 + $0x78] sm:$0xff]  ;;  %p280_p3 = scmp.lt.s32.totalorder %s837_s18, 1 }
  0x2d   : > { %679 = vmatprep.subr.mxu1 %v851_v0  ;;  %711 = vmatprep.mubr.msk.f32.mxu1 %vm852_vm0, %v851_v0  ;;  %v309_v6 = vld [vmem:[#allocation3 + $0x58] sm:$0xff]  ;;  %v407_v7 = vld [vmem:[#allocation5 + $0x70] sm:$0xff]  ;;  %v406_v8 = vld [vmem:[#allocation5 + $0x68] sm:$0xff] }
  0x2e   : > { %645 = vmatpush3.msra.mxu0 %v313_v1  ;;  %680 = vmatpush3.msra.mxu1 %v408_v5  ;;  %v308_v9 = vld [vmem:[#allocation3 + $0x50] sm:$0xff]  ;;  %v405_v10 = vld [vmem:[#allocation5 + $0x60] sm:$0xff]  ;;  %v307_v11 = vld [vmem:[#allocation3 + $0x48] sm:$0xff]  ;;  %s1026_s18 = smov (!%p280_p3, %s837_s18), 1 }
  0x2f   : > { %646 = vmatprep.subr.mxu0 %v851_v0  ;;  %681 = vmatprep.subr.mxu1 %v851_v0  ;;  %v404_v12 = vld [vmem:[#allocation5 + $0x58] sm:$0xff]  ;;  %v306_v13 = vld [vmem:[#allocation3 + $0x40] sm:$0xff]  ;;  %v403_v14 = vld [vmem:[#allocation5 + $0x50] sm:$0xff]  ;;  %s604_s13 = sshll.u32 %s1026_s18, 3 }
  0x30   : > { %647 = vmatpush3.msra.mxu0 %v312_v2  ;;  %682 = vmatpush3.msra.mxu1 %v407_v7  ;;  %v305_v15 = vld [vmem:[#allocation3 + $0x38] sm:$0xff]  ;;  %v402_v16 = vld [vmem:[#allocation5 + $0x48] sm:$0xff]  ;;  %v304_v17 = vld [vmem:[#allocation3 + $0x30] sm:$0xff]  ;;  %s283_s16 = scalar_lea.vmem %s1012_s0, %s604_s13  ;;  %s291_s27 = scalar_lea.vmem %s1017_s5, %s604_s13 }
  0x31   : > { %648 = vmatprep.subr.mxu0 %v851_v0  ;;  %683 = vmatprep.subr.mxu1 %v851_v0  ;;  %v401_v18 = vld [vmem:[#allocation5 + $0x40] sm:$0xff]  ;;  %v303_v19 = vld [vmem:[#allocation3 + $0x28] sm:$0xff]  ;;  %v400_v20 = vld [vmem:[#allocation5 + $0x38] sm:$0xff] }
  0x32   : > { %649 = vmatpush3.msra.mxu0 %v311_v3  ;;  %684 = vmatpush3.msra.mxu1 %v406_v8  ;;  %v302_v21 = vld [vmem:[#allocation3 + $0x20] sm:$0xff]  ;;  %v399_v22 = vld [vmem:[#allocation5 + $0x30] sm:$0xff]  ;;  %v301_v23 = vld [vmem:[#allocation3 + $0x18] sm:$0xff] }
  0x33   : > { %650 = vmatprep.subr.mxu0 %v851_v0  ;;  %685 = vmatprep.subr.mxu1 %v851_v0  ;;  %v398_v24 = vld [vmem:[#allocation5 + $0x28] sm:$0xff]  ;;  %v300_v25 = vld [vmem:[#allocation3 + $0x10] sm:$0xff]  ;;  %v397_v26 = vld [vmem:[#allocation5 + $0x20] sm:$0xff] }
  0x34   : > { %651 = vmatpush3.msra.mxu0 %v310_v4  ;;  %686 = vmatpush3.msra.mxu1 %v405_v10  ;;  %v299_v27 = vld [vmem:[#allocation3 + $0x8] sm:$0xff]  ;;  %v396_v28 = vld [vmem:[#allocation5 + $0x18] sm:$0xff]  ;;  %v298_v29 = vld [vmem:[#allocation3] sm:$0xff] }
  0x35   : > { %652 = vmatprep.subr.mxu0 %v851_v0  ;;  %687 = vmatprep.subr.mxu1 %v851_v0  ;;  %v297_v30 = vld [vmem:[%s283_s16] sm:$0xff]  ;;  %v395_v31 = vld [vmem:[#allocation5 + $0x10] sm:$0xff]  ;;  %v394_v32 = vld [vmem:[#allocation5 + $0x8] sm:$0xff] }
  0x36   : > { %653 = vmatpush3.msra.mxu0 %v309_v6  ;;  %688 = vmatpush3.msra.mxu1 %v404_v12  ;;  %v393_v33 = vld [vmem:[#allocation5] sm:$0xff] }
  0x37   : > { %654 = vmatprep.subr.mxu0 %v851_v0  ;;  %689 = vmatprep.subr.mxu1 %v851_v0  ;;  %v606_v34 = vld [vmem:[%s1014_s2] ss:$0 sm:$0xff] }
  0x38   : > { %655 = vmatpush3.msra.mxu0 %v308_v9  ;;  %690 = vmatpush3.msra.mxu1 %v403_v14  ;;  %v607_v39 = vld [vmem:[%s1016_s4] ss:$0 sm:$0xff] }
  0x39   : > { %656 = vmatprep.subr.mxu0 %v851_v0  ;;  %691 = vmatprep.subr.mxu1 %v851_v0 }
  0x3a   : > { %657 = vmatpush3.msra.mxu0 %v307_v11  ;;  %692 = vmatpush3.msra.mxu1 %v402_v16 }
  0x3b   : > { %658 = vmatprep.subr.mxu0 %v851_v0  ;;  %693 = vmatprep.subr.mxu1 %v851_v0 }
  0x3c   : > { %659 = vmatpush3.msra.mxu0 %v306_v13  ;;  %694 = vmatpush3.msra.mxu1 %v401_v18 }
  0x3d   : > { %660 = vmatprep.subr.mxu0 %v851_v0  ;;  %695 = vmatprep.subr.mxu1 %v851_v0 }
  0x3e   : > { %661 = vmatpush3.msra.mxu0 %v305_v15  ;;  %696 = vmatpush3.msra.mxu1 %v400_v20 }
  0x3f   : > { %662 = vmatprep.subr.mxu0 %v851_v0  ;;  %697 = vmatprep.subr.mxu1 %v851_v0 }
  0x40   : > { %663 = vmatpush3.msra.mxu0 %v304_v17  ;;  %698 = vmatpush3.msra.mxu1 %v399_v22 }
  0x41   : > { %664 = vmatprep.subr.mxu0 %v851_v0  ;;  %699 = vmatprep.subr.mxu1 %v851_v0 }
  0x42   : > { %665 = vmatpush3.msra.mxu0 %v303_v19  ;;  %700 = vmatpush3.msra.mxu1 %v398_v24 }
  0x43   : > { %666 = vmatprep.subr.mxu0 %v851_v0  ;;  %701 = vmatprep.subr.mxu1 %v851_v0 }
  0x44   : > { %667 = vmatpush3.msra.mxu0 %v302_v21  ;;  %702 = vmatpush3.msra.mxu1 %v397_v26 }
  0x45   : > { %668 = vmatprep.subr.mxu0 %v851_v0  ;;  %703 = vmatprep.subr.mxu1 %v851_v0 }
  0x46   : > { %669 = vmatpush3.msra.mxu0 %v301_v23  ;;  %704 = vmatpush3.msra.mxu1 %v396_v28 }
  0x47   : > { %670 = vmatprep.subr.mxu0 %v851_v0  ;;  %705 = vmatprep.subr.mxu1 %v851_v0 }
  0x48   : > { %671 = vmatpush3.msra.mxu0 %v300_v25  ;;  %706 = vmatpush3.msra.mxu1 %v395_v31 }
  0x49   : > { %672 = vmatprep.subr.mxu0 %v851_v0  ;;  %707 = vmatprep.subr.mxu1 %v851_v0 }
  0x4a   : > { %673 = vmatpush3.msra.mxu0 %v299_v27  ;;  %708 = vmatpush3.msra.mxu1 %v394_v32 }
  0x4b   : > { %674 = vmatprep.subr.mxu0 %v851_v0  ;;  %709 = vmatprep.subr.mxu1 %v851_v0 }
  0x4c   : > { %675 = vmatpush3.msra.mxu0 %v298_v29  ;;  %710 = vmatpush3.msra.mxu1 %v393_v33 }
  0x4d   : > { %677 = vmatmul.mubr.f32.vlgmr.msra.gmra.mxu0 %v297_v30 }
 0x10d   : > { %v387_v35 = vpop.f32.mrf.mxu0 }
 0x10e   : > { %v388_v36 = vadd.f32 %v606_v34, %v387_v35 }
 0x10f   : > { %v678_v37 = vpop.f32.mrf.mxu0 }
 0x110   : > { %v391_v38 = vmax.f32 %v388_v36, 0.0 }
 0x112   : > { %712 = vmatmul.mubr.f32.vlgmr.msra.gmra.mxu1 %v391_v38 }
 0x1d2   : > { %v475_v40 = vpop.f32.mrf.mxu1 }
 0x1d3   : > { %v492_v41 = vadd.f32 %v607_v39, %v475_v40 }
 0x1d4   : > { %v713_v42 = vpop.f32.mrf.mxu1 }
 0x1d5   : > { %493 = vst [vmem:[%s291_s27] sm:$0xff] %v492_v41 }
 0x1d6 PF: > { %s17_s20 = sadd.s32 1, %s845_s20   ;;  %s1021_s18 = smov %s841_s19 }
 0x1d7   : > { %p14_p4 = scmp.ge.s32.totalorder %s17_s20, 4   ;;  %s1022_s19 = smov %s1024_s22 }
 0x1d9   :  { %16 = sbr.rel (!%p14_p4) target bundleno = 3 (0x3), region = 92 }
 0x1de   :  { %513 = vsyncpa [#allocation4], 1 }
 0x1df   :  { %515 = vsyncpa [#allocation4 + $0x1], 1 }
 0x1e0   :  { %516 = vsyncpa [#allocation6], 1 }

</bundles_post_ra>
